<compile_context>
chip_gen: v7x
topology: tpu7x:2x2x1
jax: 0.10.0
libtpu: 0.0.40
codegen_flags: <defaults>
</compile_context>

<pallas_src>
import functools
import math

import jax
import jax.numpy as jnp
from jax import lax
from jax.experimental import pallas as pl
from jax.experimental.pallas import tpu as pltpu

C_IN = 4
C_OUT = 8
KH = KW = 3  # 3x3 conv, padding=1, stride=1


def _conv3x3_relu_kernel(x_ref, bmat_ref, bias_ref, o_ref, *, img_h):
    """One batched row-tile (B whole images) per grid step.

    x_ref:    (B*H, W*C_IN)        bf16 input rows; row = b*H + h, lane = w*C_IN + c
    bmat_ref: (3*W*C_IN, W*C_OUT)  bf16 banded weights; kh blocks stacked along K,
                                   W-border zero padding baked into the band
    bias_ref: (1, W*C_OUT)         f32 bias per output lane
    o_ref:    (B*H, W*C_OUT)       f32 output rows; lane = w*C_OUT + o
    """
    x = x_ref[...].astype(jnp.float32)                     # (M, W*C_IN)
    m = x.shape[0]

    # Row index within each image (blocks hold whole images, B*H % H == 0).
    row = lax.broadcasted_iota(jnp.int32, x.shape, 0) % img_h

    # kh = 0 tap uses x[h-1]; kh = 2 tap uses x[h+1].  pltpu.roll wraps across
    # image (and block) boundaries, so zero the first/last row of every image
    # — this is both the H-border zero padding and the wrap fix.
    x_hm1 = jnp.where(row == 0, 0.0, pltpu.roll(x, 1, 0))
    x_hp1 = jnp.where(row == img_h - 1, 0.0, pltpu.roll(x, m - 1, 0))

    # Fold the three kh taps into the contraction dim: one
    # (M, 3*W*C_IN) @ (3*W*C_IN, W*C_OUT) MXU push, lane-dense accumulator.
    xk = jnp.concatenate([x_hm1, x, x_hp1], axis=1).astype(jnp.bfloat16)
    acc = jnp.dot(xk, bmat_ref[...], preferred_element_type=jnp.float32)

    acc = acc + bias_ref[...]                              # (1, W*C_OUT) bcast
    o_ref[...] = jnp.maximum(acc, 0.0).astype(o_ref.dtype)


def _make_banded_params(weight_oihw, bias, width):
    """Pre-pack conv weights into the banded matrix (done once per width)."""
    # (C_OUT, C_IN, KH, KW) -> (KH, KW, C_IN, C_OUT)
    k_t = jnp.transpose(weight_oihw, (2, 3, 1, 0)).astype(jnp.float32)

    # sel[w_in, w_out, kw] = 1 iff w_in == w_out + kw - 1  (padding=1 band)
    w_in = jnp.arange(width)[:, None, None]
    w_out = jnp.arange(width)[None, :, None]
    kws = jnp.arange(KW)[None, None, :]
    sel = (w_in == w_out + kws - (KW // 2)).astype(jnp.float32)  # (W, W, KW)

    # band[kh, w_in*C_IN + c, w_out*C_OUT + o] = K[o, c, kh, kw] on the band
    band = jnp.einsum("xyk,hkco->hxcyo", sel, k_t)  # (KH, W, C_IN, W, C_OUT)
    bmat = band.reshape(KH * width * C_IN, width * C_OUT).astype(jnp.bfloat16)

    bias_row = jnp.tile(bias.astype(jnp.float32), width).reshape(1, width * C_OUT)
    return bmat, bias_row


def _pick_block_batch(n, h, target_rows=256):
    """Images per grid step: aim for B*H ~ 256 MXU rows (128 is enough on v5e),
    keep B*H a multiple of 16 (bf16 sublane tile), don't exceed the batch."""
    m = 16 // math.gcd(h, 16)                   # B must be a multiple of m
    b = max(m, (target_rows // max(h, 1)) // m * m)
    b = max(m, min(b, -(-n // m) * m))
    return b


@functools.partial(jax.jit, static_argnames=("img_h", "img_w", "block_batch"))
def conv2d_relu_pallas(x_nchw, bmat, bias_row, *, img_h, img_w, block_batch):
    """x_nchw: (N, C_IN, H, W) f32 -> (N, C_OUT, H, W) f32."""
    n = x_nchw.shape[0]
    h, w, b = img_h, img_w, block_batch
    wc_in, wc_out = w * C_IN, w * C_OUT

    n_pad = -(-n // b) * b
    x = x_nchw
    if n_pad != n:
        x = jnp.pad(x, ((0, n_pad - n), (0, 0), (0, 0), (0, 0)))

    # Lane-dense row layout: row = n*H + h, lane = w*C_IN + c.  bf16 halves
    # the DMA bytes; the MXU accumulates in f32.
    x_rows = jnp.transpose(x, (0, 2, 3, 1)).reshape(n_pad * h, wc_in)
    x_rows = x_rows.astype(jnp.bfloat16)

    m_blk = b * h
    kernel = functools.partial(_conv3x3_relu_kernel, img_h=h)
    out_rows = pl.pallas_call(
        kernel,
        out_shape=jax.ShapeDtypeStruct((n_pad * h, wc_out), jnp.float32),
        grid=(n_pad // b,),
        in_specs=[
            pl.BlockSpec((m_blk, wc_in), lambda i: (i, 0)),
            pl.BlockSpec((KH * wc_in, wc_out), lambda i: (0, 0)),
            pl.BlockSpec((1, wc_out), lambda i: (0, 0)),
        ],
        out_specs=pl.BlockSpec((m_blk, wc_out), lambda i: (i, 0)),
        compiler_params=pltpu.CompilerParams(
            dimension_semantics=("parallel",)),
    )(x_rows, bmat, bias_row)

    out = out_rows.reshape(n_pad, h, w, C_OUT)[:n]
    return jnp.transpose(out, (0, 3, 1, 2))


class ModuleWrapperIgnores2ndArgCNN:
    """JAX/Pallas equivalent of ModuleWrapperIgnores2ndArg_cnn."""

    def __init__(self, weight_oihw, bias):
        # Keep the PyTorch OIHW "checkpoint" layout; packed banded weights are
        # built once per spatial width and cached.
        self.weight_oihw = weight_oihw
        self.bias = bias
        self._packed = {}

    def __call__(self, x_nchw, dummy_arg=None):
        assert dummy_arg is not None, 'dummy_arg is required but was None'
        n, c, h, w = x_nchw.shape
        assert c == C_IN
        if w not in self._packed:
            self._packed[w] = _make_banded_params(self.weight_oihw, self.bias, w)
        bmat, bias_row = self._packed[w]
        block_batch = _pick_block_batch(n, h)
        return conv2d_relu_pallas(x_nchw, bmat, bias_row,
                                  img_h=h, img_w=w, block_batch=block_batch)


def _reference(x_nchw, weight_oihw, bias):
    """Pure-JAX reference (lax conv) for correctness checking."""
    y = lax.conv_general_dilated(
        x_nchw, weight_oihw,
        window_strides=(1, 1), padding=((1, 1), (1, 1)),
        dimension_numbers=('NCHW', 'OIHW', 'NCHW'))
    y = y + bias.reshape(1, C_OUT, 1, 1)
    return jnp.maximum(y, 0.0)


if __name__ == "__main__":
    key = jax.random.PRNGKey(0)
    kx, kw_, kb = jax.random.split(key, 3)

    N, H, W = 2, 16, 16
    x = jax.random.normal(kx, (N, C_IN, H, W), dtype=jnp.float32)

    # Deterministic Conv2d parameter init (kaiming-uniform-style bound).
    fan_in = C_IN * KH * KW
    bound = 1.0 / (fan_in ** 0.5)
    weight_oihw = jax.random.uniform(
        kw_, (C_OUT, C_IN, KH, KW), minval=-bound, maxval=bound,
        dtype=jnp.float32)
    bias = jax.random.uniform(
        kb, (C_OUT,), minval=-bound, maxval=bound, dtype=jnp.float32)

    module = ModuleWrapperIgnores2ndArgCNN(weight_oihw, bias)
    dummy = jnp.zeros((1,), dtype=jnp.float32)  # required, ignored

    out = jax.block_until_ready(module(x, dummy_arg=dummy))

    # Reference with bf16-quantized inputs/weights: the kernel feeds bf16
    # operands to the MXU with f32 accumulation, so after quantizing the
    # reference the only difference is summation order.
    x_q = x.astype(jnp.bfloat16).astype(jnp.float32)
    w_q = weight_oihw.astype(jnp.bfloat16).astype(jnp.float32)
    ref = jax.block_until_ready(_reference(x_q, w_q, bias))

    assert out.shape == (N, C_OUT, H, W)
    err = float(jnp.max(jnp.abs(out - ref)))
    assert jnp.allclose(out, ref, atol=2e-3, rtol=2e-3), err

    # Exercise the batched multi-step grid + batch-padding path as well.
    N2 = 40
    x2 = jax.random.normal(jax.random.PRNGKey(1), (N2, C_IN, H, W),
                           dtype=jnp.float32)
    out2 = jax.block_until_ready(module(x2, dummy_arg=dummy))
    ref2 = jax.block_until_ready(
        _reference(x2.astype(jnp.bfloat16).astype(jnp.float32), w_q, bias))
    assert out2.shape == (N2, C_OUT, H, W)
    err2 = float(jnp.max(jnp.abs(out2 - ref2)))
    assert jnp.allclose(out2, ref2, atol=2e-3, rtol=2e-3), err2

    print("KERNEL_OK")
</pallas_src>

<mosaic_0001>
module attributes {stable_mosaic.version = 11 : i64} {
  func.func @_conv3x3_relu_kernel(%arg0: i32, %arg1: memref<32x64xbf16, #tpu.memory_space<vmem>>, %arg2: memref<192x128xbf16, #tpu.memory_space<vmem>>, %arg3: memref<1x128xf32, #tpu.memory_space<vmem>>, %arg4: memref<32x128xf32, #tpu.memory_space<vmem>>) attributes {dimension_semantics = [#tpu.dimension_semantics<parallel>], iteration_bounds = array<i64: 1>, scalar_prefetch = 0 : i64, scratch_operands = 0 : i64, tpu.core_type = #tpu.core_type<tc>, window_params = [{transform_indices = @transform_0, window_bounds = array<i64: 32, 64>}, {pipeline_mode = #tpu.pipeline_mode<synchronous>, transform_indices = @transform_1, window_bounds = array<i64: 192, 128>}, {pipeline_mode = #tpu.pipeline_mode<synchronous>, transform_indices = @transform_2, window_bounds = array<i64: 1, 128>}, {transform_indices = @transform_3, window_bounds = array<i64: 32, 128>}]} {
    %c0 = arith.constant 0 : index
    %c0_0 = arith.constant 0 : index
    %0 = vector.load %arg1[%c0, %c0_0] : memref<32x64xbf16, #tpu.memory_space<vmem>>, vector<32x64xbf16>
    %1 = arith.extf %0 : vector<32x64xbf16> to vector<32x64xf32>
    %2 = tpu.iota {dimensions = array<i32: 0>} : vector<32x64xi32>
    %c16_i32 = arith.constant 16 : i32
    %c0_i32 = arith.constant 0 : i32
    %3 = arith.cmpi eq, %c16_i32, %c0_i32 : i32
    %c1_i32 = arith.constant 1 : i32
    %4 = arith.select %3, %c1_i32, %c16_i32 : i32
    %5 = vector.broadcast %4 : i32 to vector<32x64xi32>
    %6 = arith.remsi %2, %5 : vector<32x64xi32>
    %c0_i32_1 = arith.constant 0 : i32
    %7 = vector.broadcast %c0_i32_1 : i32 to vector<32x64xi32>
    %8 = arith.cmpi ne, %6, %7 : vector<32x64xi32>
    %c0_i32_2 = arith.constant 0 : i32
    %9 = vector.broadcast %c0_i32_2 : i32 to vector<32x64xi32>
    %10 = arith.cmpi slt, %6, %9 : vector<32x64xi32>
    %c0_i32_3 = arith.constant 0 : i32
    %11 = arith.cmpi slt, %4, %c0_i32_3 : i32
    %12 = vector.broadcast %11 : i1 to vector<32x64xi1>
    %13 = vector.broadcast %12 : vector<32x64xi1> to vector<32x64xi1>
    %14 = arith.xori %10, %13 : vector<32x64xi1>
    %15 = arith.andi %14, %8 : vector<32x64xi1>
    %16 = vector.broadcast %4 : i32 to vector<32x64xi32>
    %17 = arith.addi %6, %16 : vector<32x64xi32>
    %18 = arith.select %15, %17, %6 : vector<32x64xi1>, vector<32x64xi32>
    %c0_i32_4 = arith.constant 0 : i32
    %19 = vector.broadcast %c0_i32_4 : i32 to vector<32x64xi32>
    %20 = arith.cmpi eq, %18, %19 : vector<32x64xi32>
    %c1_i32_5 = arith.constant 1 : i32
    %21 = tpu.dynamic_rotate %1 by %c1_i32_5 dim 0 : vector<32x64xf32>, i32 -> vector<32x64xf32>
    %cst = arith.constant 0.000000e+00 : f32
    %22 = vector.broadcast %cst : f32 to vector<32x64xf32>
    %23 = arith.select %20, %22, %21 : vector<32x64xi1>, vector<32x64xf32>
    %c15_i32 = arith.constant 15 : i32
    %24 = vector.broadcast %c15_i32 : i32 to vector<32x64xi32>
    %25 = arith.cmpi eq, %18, %24 : vector<32x64xi32>
    %c31_i32 = arith.constant 31 : i32
    %26 = tpu.dynamic_rotate %1 by %c31_i32 dim 0 : vector<32x64xf32>, i32 -> vector<32x64xf32>
    %cst_6 = arith.constant 0.000000e+00 : f32
    %27 = vector.broadcast %cst_6 : f32 to vector<32x64xf32>
    %28 = arith.select %25, %27, %26 : vector<32x64xi1>, vector<32x64xf32>
    %29 = tpu.concatenate %23, %1, %28 in 1 : vector<32x64xf32>, vector<32x64xf32>, vector<32x64xf32> -> vector<32x192xf32>
    %30 = arith.truncf %29 : vector<32x192xf32> to vector<32x192xbf16>
    %c0_7 = arith.constant 0 : index
    %c0_8 = arith.constant 0 : index
    %31 = vector.load %arg2[%c0_7, %c0_8] : memref<192x128xbf16, #tpu.memory_space<vmem>>, vector<192x128xbf16>
    %cst_9 = arith.constant dense<0.000000e+00> : vector<32x128xf32>
    %32 = tpu.matmul %30, %31, %cst_9 {dimension_numbers = #tpu.dot_dimension_numbers<[1], [0], [0], [1], [0, 0, 1, 1], [], []>} : vector<32x192xbf16>, vector<192x128xbf16>, vector<32x128xf32> -> vector<32x128xf32>
    %c0_10 = arith.constant 0 : index
    %c0_11 = arith.constant 0 : index
    %33 = vector.load %arg3[%c0_10, %c0_11] : memref<1x128xf32, #tpu.memory_space<vmem>>, vector<1x128xf32>
    %34 = vector.broadcast %33 : vector<1x128xf32> to vector<32x128xf32>
    %35 = arith.addf %32, %34 : vector<32x128xf32>
    %cst_12 = arith.constant 0.000000e+00 : f32
    %36 = vector.broadcast %cst_12 : f32 to vector<32x128xf32>
    %37 = arith.maximumf %35, %36 : vector<32x128xf32>
    %c0_13 = arith.constant 0 : index
    %c0_14 = arith.constant 0 : index
    %38 = vector.load %arg4[%c0_13, %c0_14] : memref<32x128xf32, #tpu.memory_space<vmem>>, vector<32x128xf32>
    tpu.vector_store %arg4[%c0_13, %c0_14], %37 {strides = array<i32>} : memref<32x128xf32, #tpu.memory_space<vmem>>, vector<32x128xf32>,
    return
  }
  func.func @transform_0(%arg0: i32) -> (i32, i32) {
    %c0_i32 = arith.constant 0 : i32
    %c0_i32_0 = arith.constant 0 : i32
    return %arg0, %c0_i32 : i32, i32
  }
  func.func @transform_1(%arg0: i32) -> (i32, i32) {
    %c0_i32 = arith.constant 0 : i32
    %c0_i32_0 = arith.constant 0 : i32
    %c0_i32_1 = arith.constant 0 : i32
    return %c0_i32, %c0_i32_0 : i32, i32
  }
  func.func @transform_2(%arg0: i32) -> (i32, i32) {
    %c0_i32 = arith.constant 0 : i32
    %c0_i32_0 = arith.constant 0 : i32
    %c0_i32_1 = arith.constant 0 : i32
    return %c0_i32, %c0_i32_0 : i32, i32
  }
  func.func @transform_3(%arg0: i32) -> (i32, i32) {
    %c0_i32 = arith.constant 0 : i32
    %c0_i32_0 = arith.constant 0 : i32
    return %arg0, %c0_i32 : i32, i32
  }
}

</mosaic_0001>

<bundles_post_ra>
// kernel: conv2d_relu_pallas.1
= control target key start
LH: loop header
LB: loop body
LE: loop exit
PB: predicated region body
PF: predicated region fallthrough
CT: control target
= control target key end

     0   :  { %v23_v0 = vlaneseq  ;;  %v377_v3 = vmov 0   ;;  %s378_s19 = smov 64   ;;  %vm126_vm4 = vcmask 523264   ;;  %s528_s0 = inlined_call_operand.vmem [shape: bf16[32,64], index: 0, kind: input, shape index: {}]   ;;  %s529_s1 = inlined_call_operand.vmem [shape: bf16[192,128], index: 1, kind: input, shape index: {}]   ;;  %s530_s2 = inlined_call_operand.vmem [shape: f32[1,128], index: 2, kind: input, shape index: {}]   ;;  %s531_s3 = inlined_call_operand.vmem [shape: f32[32,128], index: 3, kind: output, shape index: {}]  }
   0x1   :  { %v321_v1 = vld [vmem:[%s528_s0] sm:$0xff]   ;;  %v328_v2 = vld [vmem:[%s528_s0 + $0x8] sm:$0xff]   ;;  %244 = vmatprep.subr.bf16.mxu0 %v377_v3  ;;  %329 = vmatprep.subr.bf16.mxu1 %v377_v3  ;;  %v367_v14 = vld [vmem:[%s529_s1 + $0x10] sm:$0xff]  }
   0x2   :  { %v322_v4 = vunpack.c.l.bf16 %v321_v1  ;;  %v407_v5 = vunpack.c.h.bf16 %v321_v1  ;;  %v409_v6 = vunpack.c.l.bf16 %v328_v2  ;;  %v327_v7 = vunpack.c.h.bf16 %v328_v2  ;;  %v365_v8 = vld [vmem:[%s529_s1] sm:$0xff]   ;;  %v366_v11 = vld [vmem:[%s529_s1 + $0x8] sm:$0xff]   ;;  %v368_v22 = vld [vmem:[%s529_s1 + $0x18] sm:$0xff]  }
   0x3   :  { %v24_v9 = vshrl.u32 %v23_v0, 7  ;;  %245 = vmatpush1.bf16.msra.mxu0 %v365_v8  ;;  %341 = vmatpush1.bf16.msra.mxu1 %v365_v8  ;;  %v369_v34 = vld [vmem:[%s529_s1 + $0x20] sm:$0xff]   ;;  %v370_v45 = vld [vmem:[%s529_s1 + $0x28] sm:$0xff]   ;;  %v371_v49 = vld [vmem:[%s529_s1 + $0x30] sm:$0xff]  }
   0x4   :  { %v355_v10 = vpack.i.bf16 %v407_v5, %v322_v4  ;;  %246 = vmatprep.subr.bf16.mxu0 %v377_v3  ;;  %330 = vmatprep.subr.bf16.mxu1 %v377_v3  ;;  %v360_v12 = vpack.i.bf16 %v327_v7, %v409_v6  ;;  %v97_v16 = vrot.slane %v322_v4, 1  ;;  %v98_v17 = vrot.slane %v407_v5, 1  ;;  %v372_v50 = vld [vmem:[%s529_s1 + $0x38] sm:$0xff]   ;;  %v373_v51 = vld [vmem:[%s529_s1 + $0x40] sm:$0xff]   ;;  %v374_v52 = vld [vmem:[%s529_s1 + $0x48] sm:$0xff]  }
   0x5   :  { %v25_v13 = vadd.s32 8, %v24_v9  ;;  %v81_v18 = vrot.slane %v407_v5, 7  ;;  %v80_v19 = vrot.slane %v322_v4, 7  ;;  %v99_v21 = vrot.slane %v409_v6, 1  ;;  %v375_v53 = vld [vmem:[%s529_s1 + $0x50] sm:$0xff]   ;;  %v376_v54 = vld [vmem:[%s529_s1 + $0x58] sm:$0xff]  }
   0x6   :  { %356 = vrot.lane.b32.xlu0 %v355_v10, %s378_s19  ;;  %vm101_vm1 = vcmp.lt.s32.totalorder %v24_v9, 7  ;;  %v32_v25 = vand.u32 15, %v24_v9  ;;  %v83_v26 = vrot.slane %v327_v7, 7  ;;  %vm84_vm2 = vcmp.lt.s32.totalorder %v24_v9, 1 }
   0x7   :  { %247 = vmatpush1.bf16.msra.mxu0 %v366_v11  ;;  %342 = vmatpush1.bf16.msra.mxu1 %v366_v11  ;;  %v39_v15 = vand.u32 15, %v25_v13  ;;  %v103_v23 = vsel %vm101_vm1, %v98_v17, %v99_v21  ;;  %v104_v24 = vsel %vm101_vm1, %v97_v16, %v98_v17  ;;  %v27_v28 = vadd.s32 24, %v24_v9 }
   0x8   :  { %248 = vmatprep.subr.bf16.mxu0 %v377_v3  ;;  %331 = vmatprep.subr.bf16.mxu1 %v377_v3  ;;  %v100_v29 = vrot.slane %v327_v7, 1  ;;  %vm442_vm3 = vcmp.eq.s32.totalorder %v32_v25, 0  ;;  %v447_v32 = vsel %vm84_vm2, %v80_v19, %v81_v18  ;;  %v450_v33 = vsel %vm84_vm2, %v83_v26, %v80_v19 }
   0x9   :  { %vm428_vm0 = vcmp.eq.s32.totalorder %v39_v15, 15  ;;  %v89_v35 = vsel %vm442_vm3, 0.0, %v450_v33  ;;  %v53_v36 = vand.u32 15, %v27_v28  ;;  %v26_v39 = vadd.s32 16, %v24_v9 }
   0xa   :  { %361 = vrot.lane.b32.xlu0 %v360_v12, %s378_s19  ;;  %v107_v27 = vsel %vm428_vm0, 0.0, %v103_v23  ;;  %v105_v37 = vsel %vm101_vm1, %v100_v29, %v97_v16  ;;  %v102_v38 = vsel %vm101_vm1, %v99_v21, %v100_v29  ;;  %v82_v40 = vrot.slane %v409_v6, 7 }
   0xb   :  { %249 = vmatpush1.bf16.msra.mxu0 %v367_v14  ;;  %343 = vmatpush1.bf16.msra.mxu1 %v367_v14  ;;  %v132_v30 = vpack.c.bf16 %v107_v27, %v104_v24  ;;  %vm96_vm5 = vcmp.eq.s32.totalorder %v53_v36, 15  ;;  %v46_v42 = vand.u32 15, %v26_v39 }
   0xc   :  { %250 = vmatprep.subr.bf16.mxu0 %v377_v3  ;;  %332 = vmatprep.subr.bf16.mxu1 %v377_v3  ;;  %v109_v41 = vsel %vm96_vm5, 0.0, %v105_v37  ;;  %v85_v43 = vsel %vm84_vm2, %v82_v40, %v83_v26  ;;  %v86_v44 = vsel %vm84_vm2, %v81_v18, %v82_v40 }
   0xd   :  { %318 = vmatprep.mubr.msk.bf16.mxu0 %vm126_vm4, %v132_v30  ;;  %v134_v46 = vpack.c.bf16 %v109_v41, %v102_v38  ;;  %vm471_vm6 = vcmp.eq.s32.totalorder %v46_v42, 0 }
   0xe   :  { %v91_v48 = vsel %vm471_vm6, 0.0, %v86_v44 }
   0xf   :  { %251 = vmatpush1.bf16.msra.mxu0 %v368_v22  ;;  %344 = vmatpush1.bf16.msra.mxu1 %v368_v22 }
  0x10   :  { %252 = vmatprep.subr.bf16.mxu0 %v377_v3  ;;  %333 = vmatprep.subr.bf16.mxu1 %v377_v3 }
  0x11   :  { %319 = vmatprep.mubr.msk.bf16.mxu1 %vm126_vm4, %v134_v46 }
  0x13   :  { %253 = vmatpush1.bf16.msra.mxu0 %v369_v34  ;;  %345 = vmatpush1.bf16.msra.mxu1 %v369_v34 }
  0x14   :  { %254 = vmatprep.subr.bf16.mxu0 %v377_v3  ;;  %334 = vmatprep.subr.bf16.mxu1 %v377_v3 }
  0x17   :  { %255 = vmatpush1.bf16.msra.mxu0 %v370_v45  ;;  %346 = vmatpush1.bf16.msra.mxu1 %v370_v45 }
  0x18   :  { %256 = vmatprep.subr.bf16.mxu0 %v377_v3  ;;  %335 = vmatprep.subr.bf16.mxu1 %v377_v3 }
  0x1b   :  { %257 = vmatpush1.bf16.msra.mxu0 %v371_v49  ;;  %347 = vmatpush1.bf16.msra.mxu1 %v371_v49 }
  0x1c   :  { %258 = vmatprep.subr.bf16.mxu0 %v377_v3  ;;  %336 = vmatprep.subr.bf16.mxu1 %v377_v3 }
  0x1f   :  { %259 = vmatpush1.bf16.msra.mxu0 %v372_v50  ;;  %348 = vmatpush1.bf16.msra.mxu1 %v372_v50 }
  0x20   :  { %260 = vmatprep.subr.bf16.mxu0 %v377_v3  ;;  %337 = vmatprep.subr.bf16.mxu1 %v377_v3 }
  0x23   :  { %261 = vmatpush1.bf16.msra.mxu0 %v373_v51  ;;  %349 = vmatpush1.bf16.msra.mxu1 %v373_v51 }
  0x24   :  { %262 = vmatprep.subr.bf16.mxu0 %v377_v3  ;;  %338 = vmatprep.subr.bf16.mxu1 %v377_v3 }
  0x27   :  { %263 = vmatpush1.bf16.msra.mxu0 %v374_v52  ;;  %350 = vmatpush1.bf16.msra.mxu1 %v374_v52 }
  0x28   :  { %264 = vmatprep.subr.bf16.mxu0 %v377_v3  ;;  %339 = vmatprep.subr.bf16.mxu1 %v377_v3 }
  0x2b   :  { %265 = vmatpush1.bf16.msra.mxu0 %v375_v53  ;;  %351 = vmatpush1.bf16.msra.mxu1 %v375_v53 }
  0x2c   :  { %266 = vmatprep.subr.bf16.mxu0 %v377_v3  ;;  %340 = vmatprep.subr.bf16.mxu1 %v377_v3  ;;  %v305_v3 = vld [vmem:[%s530_s2] ss:$0 sm:$0xff] }
  0x2f   :  { %267 = vmatpush1.bf16.msra.mxu0 %v376_v54  ;;  %352 = vmatpush1.bf16.msra.mxu1 %v376_v54 }
  0x78   :  { %v357_v55 = vpop.permute.xlu0 %356 }
  0x79   :  { %v359_v56 = vunpack.i.h.bf16 %v357_v55  ;;  %v358_v57 = vunpack.i.l.bf16 %v357_v55 }
  0x7b   :  { %v127_v58 = vsel %vm126_vm4, %v89_v35, %v358_v57  ;;  %v128_v59 = vsel %vm126_vm4, %v447_v32, %v359_v56 }
  0x7c   :  { %v362_v60 = vpop.permute.xlu0 %361  ;;  %v131_v61 = vpack.c.bf16 %v128_v59, %v127_v58 }
  0x7d   :  { %v364_v62 = vunpack.i.h.bf16 %v362_v60  ;;  %v363_v63 = vunpack.i.l.bf16 %v362_v60 }
  0x7e   :  { %277 = vmatmul.mubr.bf16.vlgmr.msra.gmra.mrb[0].mxu0 %v131_v61 }
  0x7f   :  { %v129_v0 = vsel %vm126_vm4, %v91_v48, %v363_v63  ;;  %v130_v1 = vsel %vm126_vm4, %v85_v43, %v364_v62 }
  0x80   :  { %v133_v2 = vpack.c.bf16 %v130_v1, %v129_v0 }
  0x82   :  { %285 = vmatmul.mubr.bf16.vlgmr.msra.gmra.mrb[0].mxu1 %v133_v2 }
 0x151   :  { %v278_v4 = vpop.f32.mrb[0].mxu0 }
 0x152   :  { %v279_v5 = vadd.f32 %v305_v3, %v278_v4  ;;  %v280_v6 = vpop.f32.mrb[1].mxu0 }
 0x153   :  { %v281_v7 = vpop.f32.mrb[2].mxu0 }
 0x154   :  { %v293_v8 = vmax.f32 %v279_v5, 0.0  ;;  %v282_v9 = vadd.f32 %v305_v3, %v281_v7  ;;  %v283_v10 = vpop.f32.mrb[3].mxu0 }
 0x155   :  { %v286_v11 = vpop.f32.mrb[0].mxu1 }
 0x156   :  { %297 = vst [vmem:[%s531_s3] sm:$0xff] %v293_v8  ;;  %v294_v12 = vmax.f32 %v282_v9, 0.0  ;;  %v287_v13 = vadd.f32 %v305_v3, %v286_v11  ;;  %v288_v14 = vpop.f32.mrb[1].mxu1 }
 0x157   :  { %v289_v15 = vpop.f32.mrb[2].mxu1 }
 0x158   :  { %298 = vst [vmem:[%s531_s3 + $0x8] sm:$0xff] %v294_v12  ;;  %v295_v16 = vmax.f32 %v287_v13, 0.0  ;;  %v290_v17 = vadd.f32 %v305_v3, %v289_v15  ;;  %v291_v18 = vpop.f32.mrb[3].mxu1 }
 0x15a   :  { %299 = vst [vmem:[%s531_s3 + $0x10] sm:$0xff] %v295_v16  ;;  %v296_v19 = vmax.f32 %v290_v17, 0.0 }
 0x15c   :  { %300 = vst [vmem:[%s531_s3 + $0x18] sm:$0xff] %v296_v19 }

</bundles_post_ra>
